<compile_context>
chip_gen: v6e
topology: v6e:2x2x1
jax: 0.10.0
libtpu: 0.0.40
codegen_flags: <defaults>
</compile_context>

<pallas_src>
import jax
import jax.numpy as jnp
from jax.experimental import pallas as pl
from jax.experimental.pallas import tpu as pltpu


def _device_kind():
    try:
        return jax.devices()[0].device_kind.lower()
    except Exception:
        return ""


def _exp_dtype_for_device():
    # v6e / v7x have a bf16 EUP (exp at ~2x rate); v5e and older do not.
    kind = _device_kind()
    return jnp.bfloat16 if ("v6" in kind or "v7" in kind) else jnp.float32


def _default_num_batch_blocks(B, S):
    """Grid size along batch.

    Prefer >= 2 grid steps (DMA double-buffering + both v7x TensorCores),
    taking the largest divisor of B that still keeps per-step rows
    bb*S >= 256 so the MXU stays reasonably filled; fall back to 2 steps
    for small feature maps.
    """
    if B < 2:
        return 1
    divisors = [d for d in range(2, B + 1) if B % d == 0]
    for d in sorted(divisors, reverse=True):
        if (B // d) * S >= 256:
            return d
    return 2


def _vmem_limit_bytes(M, C, S, bb):
    """Rough per-step VMEM budget -> vmem_limit_bytes with a per-gen cap."""
    est = 0
    est += 2 * 2 * M * C * 4                       # double-buffered x-in + out
    est += C * 3 * C * 2 + C * C * 2 + 4 * C * 4   # weights + biases
    est += M * 3 * C * (4 + 2)                     # qkv f32 transient + bf16 copy
    est += 2 * bb * S * S * 4                      # scores + exp transients (worst case f32)
    est += M * C * (2 + 4)                         # r_buf scratch + f32 out transient
    est = int(est * 1.5) + (1 << 20)               # headroom for compiler temporaries
    kind = _device_kind()
    phys_cap = 48 * (1 << 20) if "v7" in kind else 100 * (1 << 20)
    return max(32 * (1 << 20), min(est, phys_cap))


def _attention_kernel_factory(n_heads, d_k, n_channels, seq_len,
                              batch_per_block, exp_dtype):
    C = n_channels
    S = seq_len
    bb = batch_per_block
    M = bb * S  # rows per block: batch folded into the matmul M dimension

    def kernel(x_ref, wp_ref, bp_ref, wo_ref, bo_ref, o_ref, r_buf):
        # x_ref : (M, C)   f32   (bb batch elements, S tokens each)
        # wp_ref: (C, 3C)  bf16  columns [Q | K | V], heads contiguous, scale folded into Q
        # bp_ref: (1, 3C)  f32   (scale folded into the Q third)
        # wo_ref: (C, C)   bf16  un-reshaped output projection
        # bo_ref: (1, C)   f32
        # o_ref : (M, C)   f32
        # r_buf : (M, C)   bf16  VMEM scratch, per-head PV results packed on lanes
        x = x_ref[...]                       # keep f32 copy for the residual
        xb = x.astype(jnp.bfloat16)

        # ---- QKV projection: single MXU matmul with M = bb*S rows ----------
        qkv = jnp.dot(xb, wp_ref[...], preferred_element_type=jnp.float32)
        qkv = (qkv + bp_ref[0]).astype(jnp.bfloat16)     # single cast, (M, 3C) bf16

        # ---- per-head attention, results lane-packed into r_buf ------------
        # TODO(synk): for n_heads >= 4 replace the static unroll with a
        # head-batched dot_general path (needs an S<->heads relayout); the
        # unroll is negligible at n_heads == 2.
        for h in range(n_heads):
            q = qkv[:, h * d_k:(h + 1) * d_k].reshape(bb, S, d_k)
            k = qkv[:, C + h * d_k:C + (h + 1) * d_k].reshape(bb, S, d_k)
            v = qkv[:, 2 * C + h * d_k:2 * C + (h + 1) * d_k].reshape(bb, S, d_k)

            # scores[b,i,j] = <q_i, k_j> (nt-form dot_general; no explicit k.T)
            s = jnp.einsum('bid,bjd->bij', q, k,
                           preferred_element_type=jnp.float32)      # (bb,S,S) f32
            m = jnp.max(s, axis=-1, keepdims=True)
            p = jnp.exp((s - m).astype(exp_dtype))                  # bf16 EUP on v6e/v7x
            l = jnp.sum(p, axis=-1, keepdims=True,
                        dtype=jnp.float32)                          # (bb,S,1) f32

            r = jnp.einsum('bij,bjd->bid', p.astype(jnp.bfloat16), v,
                           preferred_element_type=jnp.float32)      # (bb,S,d_k) f32
            # deferred softmax normalization: scale the (S,d_k) PV result
            # instead of the (S,S) probability tile
            r = r * pl.reciprocal(l, approx=True)

            r_buf[:, h * d_k:(h + 1) * d_k] = (
                r.reshape(M, d_k).astype(jnp.bfloat16))

        # ---- merged output projection: one (M,C)x(C,C) matmul --------------
        out = jnp.dot(r_buf[...], wo_ref[...],
                      preferred_element_type=jnp.float32)
        o_ref[...] = (out + bo_ref[0] + x).astype(o_ref.dtype)      # f32 residual

    return kernel


def attention_block(x_nchw, w_proj, b_proj, w_out, b_out, *, n_heads,
                    num_batch_blocks=None):
    """x_nchw: (B, C, H, W).  Linear weights stored (in_features, out_features)."""
    B, C, H, W = x_nchw.shape
    S = H * W
    d_k = C // n_heads
    scale = float(d_k) ** -0.5

    if num_batch_blocks is None:
        num_batch_blocks = _default_num_batch_blocks(B, S)
    if B % num_batch_blocks != 0:
        num_batch_blocks = 1
    bb = B // num_batch_blocks
    M = bb * S

    # NCHW -> (B*S, C): matches x.view(B, C, -1).permute(0, 2, 1).
    x_2d = jnp.transpose(x_nchw.reshape(B, C, S), (0, 2, 1)).reshape(B * S, C)

    # Permute projection columns from per-head [q_h|k_h|v_h] interleaving to a
    # global [Q | K | V] layout (each C wide, heads contiguous in d_k chunks),
    # so the kernel slices contiguous chunks instead of strided ones.
    wp = w_proj.reshape(C, n_heads, 3, d_k).transpose(0, 2, 1, 3).reshape(C, 3 * C)
    bp = b_proj.reshape(n_heads, 3, d_k).transpose(1, 0, 2).reshape(1, 3 * C)

    # Fold the 1/sqrt(d_k) softmax scale into the Q columns + Q bias
    # (weight-side constant fold; done in f32 before the bf16 cast).
    q_scale = jnp.concatenate([jnp.full((C,), scale, dtype=jnp.float32),
                               jnp.ones((2 * C,), dtype=jnp.float32)])
    wp = wp * q_scale[None, :]
    bp = bp * q_scale[None, :]

    # bf16 weights for the MXU (accumulation stays f32 inside the kernel).
    wp = wp.astype(jnp.bfloat16)
    wo = w_out.astype(jnp.bfloat16)          # (C, C), un-reshaped
    bo = b_out.reshape(1, C)

    exp_dtype = _exp_dtype_for_device()
    kernel = _attention_kernel_factory(n_heads, d_k, C, S, bb, exp_dtype)

    out_2d = pl.pallas_call(
        kernel,
        out_shape=jax.ShapeDtypeStruct((B * S, C), x_2d.dtype),
        grid_spec=pltpu.PrefetchScalarGridSpec(
            num_scalar_prefetch=0,
            grid=(num_batch_blocks,),
            in_specs=[
                pl.BlockSpec((M, C), lambda i: (i, 0)),
                pl.BlockSpec((C, 3 * C), lambda i: (0, 0)),
                pl.BlockSpec((1, 3 * C), lambda i: (0, 0)),
                pl.BlockSpec((C, C), lambda i: (0, 0)),
                pl.BlockSpec((1, C), lambda i: (0, 0)),
            ],
            out_specs=pl.BlockSpec((M, C), lambda i: (i, 0)),
            scratch_shapes=[pltpu.VMEM((M, C), jnp.bfloat16)],
        ),
        compiler_params=pltpu.CompilerParams(
            dimension_semantics=("parallel",),
            vmem_limit_bytes=_vmem_limit_bytes(M, C, S, bb)),
    )(x_2d, wp, bp, wo, bo)

    # (B*S, C) -> (B, S, C) -> NCHW  (matches permute(0,2,1).reshape(B,C,H,W))
    return jnp.transpose(out_2d.reshape(B, S, C), (0, 2, 1)).reshape(B, C, H, W)


def attention_block_ref(x_nchw, w_proj, b_proj, w_out, b_out, *, n_heads):
    """Pure-JAX (f32) reference mirroring the PyTorch forward exactly."""
    B, C, H, W = x_nchw.shape
    d_k = C // n_heads
    scale = float(d_k) ** -0.5
    x = jnp.transpose(x_nchw.reshape(B, C, -1), (0, 2, 1))          # (B, S, C)
    qkv = (x @ w_proj + b_proj).reshape(B, -1, n_heads, 3 * d_k)
    q, k, v = jnp.split(qkv, 3, axis=-1)
    attn = jnp.einsum('bihd,bjhd->bijh', q, k) * scale
    attn = jax.nn.softmax(attn, axis=2)
    res = jnp.einsum('bijh,bjhd->bihd', attn, v)
    res = res.reshape(B, -1, n_heads * d_k)
    res = res @ w_out + b_out
    res = res + x
    return jnp.transpose(res, (0, 2, 1)).reshape(B, C, H, W)


if __name__ == "__main__":
    # Small config consistent with the module: n_channels=64, n_heads=2,
    # d_k=32, spatial 8x8 (S=64), batch 2.  GroupNorm(32, 64) exists in
    # __init__ but is unused by forward(), so no norm params are needed.
    B, C, H, W = 2, 64, 8, 8
    n_heads = 2

    key = jax.random.PRNGKey(0)
    kx, kwp, kbp, kwo, kbo = jax.random.split(key, 5)

    x = jax.random.normal(kx, (B, C, H, W), dtype=jnp.float32)
    # Linear weights stored as (in_features, out_features); deterministic init.
    w_proj = jax.random.normal(kwp, (C, 3 * C), dtype=jnp.float32) * 0.05
    b_proj = jax.random.normal(kbp, (3 * C,), dtype=jnp.float32) * 0.05
    w_out = jax.random.normal(kwo, (C, C), dtype=jnp.float32) * 0.05
    b_out = jax.random.normal(kbo, (C,), dtype=jnp.float32) * 0.05

    out = attention_block(x, w_proj, b_proj, w_out, b_out, n_heads=n_heads)
    out = jax.block_until_ready(out)

    ref = attention_block_ref(x, w_proj, b_proj, w_out, b_out, n_heads=n_heads)
    assert out.shape == (B, C, H, W)
    # bf16 MXU inputs (f32 accumulation), bf16 exp on v6e/v7x, and the approx
    # reciprocal -> slightly looser tolerance vs. the pure-f32 reference.
    max_err = float(jnp.max(jnp.abs(out - ref)))
    assert jnp.allclose(out, ref, rtol=2e-2, atol=2e-2), (
        f"mismatch vs reference; max abs err = {max_err}")

    print("KERNEL_OK")
</pallas_src>

<mosaic_0001>
module attributes {stable_mosaic.version = 11 : i64} {
  func.func @kernel(%arg0: i32, %arg1: memref<64x64xf32, #tpu.memory_space<vmem>>, %arg2: memref<64x192xbf16, #tpu.memory_space<vmem>>, %arg3: memref<1x192xf32, #tpu.memory_space<vmem>>, %arg4: memref<64x64xbf16, #tpu.memory_space<vmem>>, %arg5: memref<1x64xf32, #tpu.memory_space<vmem>>, %arg6: memref<64x64xf32, #tpu.memory_space<vmem>>, %arg7: memref<64x64xbf16, #tpu.memory_space<vmem>>) attributes {dimension_semantics = [#tpu.dimension_semantics<parallel>], iteration_bounds = array<i64: 2>, scalar_prefetch = 0 : i64, scratch_operands = 1 : i64, tpu.core_type = #tpu.core_type<tc>, window_params = [{transform_indices = @transform_0, window_bounds = array<i64: 64, 64>}, {pipeline_mode = #tpu.pipeline_mode<synchronous>, transform_indices = @transform_1, window_bounds = array<i64: 64, 192>}, {pipeline_mode = #tpu.pipeline_mode<synchronous>, transform_indices = @transform_2, window_bounds = array<i64: 1, 192>}, {pipeline_mode = #tpu.pipeline_mode<synchronous>, transform_indices = @transform_3, window_bounds = array<i64: 64, 64>}, {pipeline_mode = #tpu.pipeline_mode<synchronous>, transform_indices = @transform_4, window_bounds = array<i64: 1, 64>}, {transform_indices = @transform_5, window_bounds = array<i64: 64, 64>}]} {
    %c0 = arith.constant 0 : index
    %c0_0 = arith.constant 0 : index
    %0 = vector.load %arg1[%c0, %c0_0] : memref<64x64xf32, #tpu.memory_space<vmem>>, vector<64x64xf32>
    %1 = arith.truncf %0 : vector<64x64xf32> to vector<64x64xbf16>
    %c0_1 = arith.constant 0 : index
    %c0_2 = arith.constant 0 : index
    %2 = vector.load %arg2[%c0_1, %c0_2] : memref<64x192xbf16, #tpu.memory_space<vmem>>, vector<64x192xbf16>
    %cst = arith.constant dense<0.000000e+00> : vector<64x192xf32>
    %3 = tpu.matmul %1, %2, %cst {dimension_numbers = #tpu.dot_dimension_numbers<[1], [0], [0], [1], [0, 0, 1, 1], [], []>} : vector<64x64xbf16>, vector<64x192xbf16>, vector<64x192xf32> -> vector<64x192xf32>
    %c0_3 = arith.constant 0 : index
    %c0_4 = arith.constant 0 : index
    %4 = vector.load %arg3[%c0_3, %c0_4] : memref<1x192xf32, #tpu.memory_space<vmem>>, vector<1x192xf32>
    %5 = vector.shape_cast %4 : vector<1x192xf32> to vector<192xf32>
    %6 = vector.shape_cast %5 : vector<192xf32> to vector<1x192xf32>
    %7 = vector.broadcast %6 : vector<1x192xf32> to vector<64x192xf32>
    %8 = arith.addf %3, %7 : vector<64x192xf32>
    %9 = arith.truncf %8 : vector<64x192xf32> to vector<64x192xbf16>
    %10 = vector.extract_strided_slice %9 {offsets = [0, 0], sizes = [64, 32], strides = [1, 1]} : vector<64x192xbf16> to vector<64x32xbf16>
    %11 = vector.shape_cast %10 : vector<64x32xbf16> to vector<1x64x32xbf16>
    %12 = vector.extract_strided_slice %9 {offsets = [0, 64], sizes = [64, 32], strides = [1, 1]} : vector<64x192xbf16> to vector<64x32xbf16>
    %13 = vector.shape_cast %12 : vector<64x32xbf16> to vector<1x64x32xbf16>
    %14 = vector.extract_strided_slice %9 {offsets = [0, 128], sizes = [64, 32], strides = [1, 1]} : vector<64x192xbf16> to vector<64x32xbf16>
    %15 = vector.shape_cast %14 : vector<64x32xbf16> to vector<1x64x32xbf16>
    "tpu.trace_start"() <{level = 10 : i32, message = "bid,bjd->bij"}> : () -> ()
    %cst_5 = arith.constant dense<0.000000e+00> : vector<1x64x64xf32>
    %16 = tpu.matmul %11, %13, %cst_5 {dimension_numbers = #tpu.dot_dimension_numbers<[2], [2], [1], [1], [0, 0, 0, 1, 1, 1], [0], [0]>} : vector<1x64x32xbf16>, vector<1x64x32xbf16>, vector<1x64x64xf32> -> vector<1x64x64xf32>
    "tpu.trace_stop"() : () -> ()
    %cst_6 = arith.constant dense<0xFF800000> : vector<1x64xf32>
    %17 = vector.multi_reduction <maximumf>, %16, %cst_6 [2] : vector<1x64x64xf32> to vector<1x64xf32>
    %18 = vector.shape_cast %17 : vector<1x64xf32> to vector<1x64x1xf32>
    %19 = vector.broadcast %18 : vector<1x64x1xf32> to vector<1x64x64xf32>
    %20 = arith.subf %16, %19 : vector<1x64x64xf32>
    %21 = math.exp %20 : vector<1x64x64xf32>
    %cst_7 = arith.constant dense<0.000000e+00> : vector<1x64xf32>
    %22 = vector.multi_reduction <add>, %21, %cst_7 [2] : vector<1x64x64xf32> to vector<1x64xf32>
    %23 = vector.shape_cast %22 : vector<1x64xf32> to vector<1x64x1xf32>
    %24 = arith.truncf %21 : vector<1x64x64xf32> to vector<1x64x64xbf16>
    "tpu.trace_start"() <{level = 10 : i32, message = "bij,bjd->bid"}> : () -> ()
    %cst_8 = arith.constant dense<0.000000e+00> : vector<1x64x32xf32>
    %25 = tpu.matmul %24, %15, %cst_8 {dimension_numbers = #tpu.dot_dimension_numbers<[2], [1], [1], [2], [0, 0, 0, 1, 1, 2], [0], [0]>} : vector<1x64x64xbf16>, vector<1x64x32xbf16>, vector<1x64x32xf32> -> vector<1x64x32xf32>
    "tpu.trace_stop"() : () -> ()
    %26 = tpu.reciprocal %23 {approx = true} : vector<1x64x1xf32> -> vector<1x64x1xf32>
    %27 = vector.broadcast %26 : vector<1x64x1xf32> to vector<1x64x32xf32>
    %28 = arith.mulf %25, %27 : vector<1x64x32xf32>
    %29 = vector.shape_cast %28 : vector<1x64x32xf32> to vector<64x32xf32>
    %30 = arith.truncf %29 : vector<64x32xf32> to vector<64x32xbf16>
    %c0_9 = arith.constant 0 : index
    %c0_10 = arith.constant 0 : index
    %31 = vector.load %arg7[%c0_9, %c0_10] : memref<64x64xbf16, #tpu.memory_space<vmem>>, vector<64x32xbf16>
    tpu.vector_store %arg7[%c0_9, %c0_10], %30 {strides = array<i32>} : memref<64x64xbf16, #tpu.memory_space<vmem>>, vector<64x32xbf16>,
    %32 = vector.extract_strided_slice %9 {offsets = [0, 32], sizes = [64, 32], strides = [1, 1]} : vector<64x192xbf16> to vector<64x32xbf16>
    %33 = vector.shape_cast %32 : vector<64x32xbf16> to vector<1x64x32xbf16>
    %34 = vector.extract_strided_slice %9 {offsets = [0, 96], sizes = [64, 32], strides = [1, 1]} : vector<64x192xbf16> to vector<64x32xbf16>
    %35 = vector.shape_cast %34 : vector<64x32xbf16> to vector<1x64x32xbf16>
    %36 = vector.extract_strided_slice %9 {offsets = [0, 160], sizes = [64, 32], strides = [1, 1]} : vector<64x192xbf16> to vector<64x32xbf16>
    %37 = vector.shape_cast %36 : vector<64x32xbf16> to vector<1x64x32xbf16>
    "tpu.trace_start"() <{level = 10 : i32, message = "bid,bjd->bij"}> : () -> ()
    %cst_11 = arith.constant dense<0.000000e+00> : vector<1x64x64xf32>
    %38 = tpu.matmul %33, %35, %cst_11 {dimension_numbers = #tpu.dot_dimension_numbers<[2], [2], [1], [1], [0, 0, 0, 1, 1, 1], [0], [0]>} : vector<1x64x32xbf16>, vector<1x64x32xbf16>, vector<1x64x64xf32> -> vector<1x64x64xf32>
    "tpu.trace_stop"() : () -> ()
    %cst_12 = arith.constant dense<0xFF800000> : vector<1x64xf32>
    %39 = vector.multi_reduction <maximumf>, %38, %cst_12 [2] : vector<1x64x64xf32> to vector<1x64xf32>
    %40 = vector.shape_cast %39 : vector<1x64xf32> to vector<1x64x1xf32>
    %41 = vector.broadcast %40 : vector<1x64x1xf32> to vector<1x64x64xf32>
    %42 = arith.subf %38, %41 : vector<1x64x64xf32>
    %43 = math.exp %42 : vector<1x64x64xf32>
    %cst_13 = arith.constant dense<0.000000e+00> : vector<1x64xf32>
    %44 = vector.multi_reduction <add>, %43, %cst_13 [2] : vector<1x64x64xf32> to vector<1x64xf32>
    %45 = vector.shape_cast %44 : vector<1x64xf32> to vector<1x64x1xf32>
    %46 = arith.truncf %43 : vector<1x64x64xf32> to vector<1x64x64xbf16>
    "tpu.trace_start"() <{level = 10 : i32, message = "bij,bjd->bid"}> : () -> ()
    %cst_14 = arith.constant dense<0.000000e+00> : vector<1x64x32xf32>
    %47 = tpu.matmul %46, %37, %cst_14 {dimension_numbers = #tpu.dot_dimension_numbers<[2], [1], [1], [2], [0, 0, 0, 1, 1, 2], [0], [0]>} : vector<1x64x64xbf16>, vector<1x64x32xbf16>, vector<1x64x32xf32> -> vector<1x64x32xf32>
    "tpu.trace_stop"() : () -> ()
    %48 = tpu.reciprocal %45 {approx = true} : vector<1x64x1xf32> -> vector<1x64x1xf32>
    %49 = vector.broadcast %48 : vector<1x64x1xf32> to vector<1x64x32xf32>
    %50 = arith.mulf %47, %49 : vector<1x64x32xf32>
    %51 = vector.shape_cast %50 : vector<1x64x32xf32> to vector<64x32xf32>
    %52 = arith.truncf %51 : vector<64x32xf32> to vector<64x32xbf16>
    %c0_15 = arith.constant 0 : index
    %c32 = arith.constant 32 : index
    %53 = vector.load %arg7[%c0_15, %c32] : memref<64x64xbf16, #tpu.memory_space<vmem>>, vector<64x32xbf16>
    tpu.vector_store %arg7[%c0_15, %c32], %52 {strides = array<i32>} : memref<64x64xbf16, #tpu.memory_space<vmem>>, vector<64x32xbf16>,
    %c0_16 = arith.constant 0 : index
    %c0_17 = arith.constant 0 : index
    %54 = vector.load %arg7[%c0_16, %c0_17] : memref<64x64xbf16, #tpu.memory_space<vmem>>, vector<64x64xbf16>
    %c0_18 = arith.constant 0 : index
    %c0_19 = arith.constant 0 : index
    %55 = vector.load %arg4[%c0_18, %c0_19] : memref<64x64xbf16, #tpu.memory_space<vmem>>, vector<64x64xbf16>
    %cst_20 = arith.constant dense<0.000000e+00> : vector<64x64xf32>
    %56 = tpu.matmul %54, %55, %cst_20 {dimension_numbers = #tpu.dot_dimension_numbers<[1], [0], [0], [1], [0, 0, 1, 1], [], []>} : vector<64x64xbf16>, vector<64x64xbf16>, vector<64x64xf32> -> vector<64x64xf32>
    %c0_21 = arith.constant 0 : index
    %c0_22 = arith.constant 0 : index
    %57 = vector.load %arg5[%c0_21, %c0_22] : memref<1x64xf32, #tpu.memory_space<vmem>>, vector<1x64xf32>
    %58 = vector.shape_cast %57 : vector<1x64xf32> to vector<64xf32>
    %59 = vector.shape_cast %58 : vector<64xf32> to vector<1x64xf32>
    %60 = vector.broadcast %59 : vector<1x64xf32> to vector<64x64xf32>
    %61 = arith.addf %56, %60 : vector<64x64xf32>
    %62 = arith.addf %61, %0 : vector<64x64xf32>
    %c0_23 = arith.constant 0 : index
    %c0_24 = arith.constant 0 : index
    %63 = vector.load %arg6[%c0_23, %c0_24] : memref<64x64xf32, #tpu.memory_space<vmem>>, vector<64x64xf32>
    tpu.vector_store %arg6[%c0_23, %c0_24], %62 {strides = array<i32>} : memref<64x64xf32, #tpu.memory_space<vmem>>, vector<64x64xf32>,
    return
  }
  func.func @transform_0(%arg0: i32) -> (i32, i32) {
    %c0_i32 = arith.constant 0 : i32
    %c0_i32_0 = arith.constant 0 : i32
    return %arg0, %c0_i32 : i32, i32
  }
  func.func @transform_1(%arg0: i32) -> (i32, i32) {
    %c0_i32 = arith.constant 0 : i32
    %c0_i32_0 = arith.constant 0 : i32
    %c0_i32_1 = arith.constant 0 : i32
    return %c0_i32, %c0_i32_0 : i32, i32
  }
  func.func @transform_2(%arg0: i32) -> (i32, i32) {
    %c0_i32 = arith.constant 0 : i32
    %c0_i32_0 = arith.constant 0 : i32
    %c0_i32_1 = arith.constant 0 : i32
    return %c0_i32, %c0_i32_0 : i32, i32
  }
  func.func @transform_3(%arg0: i32) -> (i32, i32) {
    %c0_i32 = arith.constant 0 : i32
    %c0_i32_0 = arith.constant 0 : i32
    %c0_i32_1 = arith.constant 0 : i32
    return %c0_i32, %c0_i32_0 : i32, i32
  }
  func.func @transform_4(%arg0: i32) -> (i32, i32) {
    %c0_i32 = arith.constant 0 : i32
    %c0_i32_0 = arith.constant 0 : i32
    %c0_i32_1 = arith.constant 0 : i32
    return %c0_i32, %c0_i32_0 : i32, i32
  }
  func.func @transform_5(%arg0: i32) -> (i32, i32) {
    %c0_i32 = arith.constant 0 : i32
    %c0_i32_0 = arith.constant 0 : i32
    return %arg0, %c0_i32 : i32, i32
  }
}

</mosaic_0001>

<bundles_post_ra>
// kernel: tpu_custom_call.1
= control target key start
LH: loop header
LB: loop body
LE: loop exit
PB: predicated region body
PF: predicated region fallthrough
CT: control target
= control target key end

     0   :  { %s1629_s18 = smov 0   ;;  %s1987_s0 = inlined_call_operand.vmem [shape: f32[128,64], index: 0, kind: input, shape index: {}]   ;;  %s1988_s1 = inlined_call_operand.vmem [shape: bf16[64,192], index: 1, kind: input, shape index: {}]   ;;  %s1989_s2 = inlined_call_operand.vmem [shape: f32[1,192], index: 2, kind: input, shape index: {}]   ;;  %s1990_s3 = inlined_call_operand.vmem [shape: bf16[64,64], index: 3, kind: input, shape index: {}]   ;;  %s1991_s4 = inlined_call_operand.vmem [shape: f32[1,64], index: 4, kind: input, shape index: {}]   ;;  %s1992_s5 = inlined_call_operand.vmem [shape: f32[128,64], index: 5, kind: output, shape index: {}]  }
   0x1 LB: > { %s1270_s19 = sadd.s32 4294967295, %s1593_s18   ;;  %p1274_p0 = scmp.ge.s32.totalorder %s1593_s18, 1  ;;  %s1593_s18 = sphi %s1629_s18, %s15_s18  }
   0x2   : > { %p188_p1 = scmp.lt.s32.totalorder %s1593_s18, 3 }
   0x4   : > { %p189_p2 = pnand %p1274_p0, %p188_p1 }
   0x5   : > { %s1275_s22 = sshll.u32 (!%p189_p2), %s1270_s19, 3  ;;  %s1596_s19 = smov (!%p189_p2), 64  }
   0x6   : > { %192 = sbr.rel (%p189_p2) target bundleno = 1338 (0x53a), region = 40  ;;  %p217_p3 = scmp.lt.s32.totalorder (!%p189_p2), %s1275_s22, 15 }
   0x7   : > { %s1597_s20 = smov (!%p189_p2), 32   ;;  %s1598_s21 = smov (!%p189_p2), 96  }
   0xb   : > { %v1502_v0 = vld [vmem:[%s1988_s1 + $0x34] ss:$8 sps:$4 sm:$0xff]   ;;  %v1504_v1 = vld [vmem:[%s1988_s1 + $0x30] ss:$8 sps:$4 sm:$0xff]   ;;  %v1595_v2 = vmov 0   ;;  %s1994_s22 = smov (!%p217_p3, %s1275_s22), 15  ;;  %v251_v21 = vlaneseq }
   0xc   : > { %346 = vmatprep.mubr.bf16.mxu0 %v1595_v2  ;;  %322 = vmatprep.subr.bf16.mxu0 %v1502_v0  ;;  %v1505_v3 = vld [vmem:[%s1988_s1 + $0x24] ss:$8 sps:$4 sm:$0xff]   ;;  %v1507_v4 = vld [vmem:[%s1988_s1 + $0x20] ss:$8 sps:$4 sm:$0xff]   ;;  %v1508_v5 = vld [vmem:[%s1988_s1 + $0x14] ss:$8 sps:$4 sm:$0xff]  }
   0xd   : > { %323 = vmatpush1.bf16.msra.mxu0 %v1504_v1  ;;  %s1276_s6 = sshll.u32 %s1994_s22, 3  ;;  %v1510_v6 = vld [vmem:[%s1988_s1 + $0x10] ss:$8 sps:$4 sm:$0xff]   ;;  %v1511_v7 = vld [vmem:[%s1988_s1 + $0x4] ss:$8 sps:$4 sm:$0xff]   ;;  %vm301_vm0 = vcmask 523264  }
   0xe   : > { %324 = vmatprep.subr.bf16.mxu0 %v1505_v3  ;;  %s1666_s13 = scalar_lea.vmem %s1987_s0, %s1276_s6  ;;  %v1513_v8 = vld [vmem:[%s1988_s1] ss:$8 sps:$4 sm:$0xff]   ;;  %v252_v22 = vshrl.u32 %v251_v21, 7  ;;  %vm407_vm1 = vcmask 261120   ;;  %vm698_vm2 = vcmask 257024   ;;  %vm1045_vm3 = vcmask 519424   ;;  %s1958_s11 = scalar_lea.vmem %s1992_s5, %s1276_s6 }
   0xf   : > { %v1672_v9 = vld [vmem:[%s1666_s13] sm:$0xff]  ;;  %v1675_v10 = vld [vmem:[%s1666_s13 + $0x8] sm:$0xff]  ;;  %v1681_v12 = vld [vmem:[%s1666_s13 + $0x10] sm:$0xff] }
  0x10   : > { %v237_v11 = vpack.c.bf16 %v1675_v10, %v1672_v9  ;;  %v1684_v13 = vld [vmem:[%s1666_s13 + $0x18] sm:$0xff]  ;;  %v1690_v15 = vld [vmem:[%s1666_s13 + $0x20] sm:$0xff]  ;;  %v234_v16 = vld [vmem:[%s1666_s13 + $0x28] sm:$0xff]  ;;  %v253_v23 = vsub.s32 0, %v252_v22  ;;  %v257_v48 = vsub.s32 1, %v252_v22 }
  0x11   : > { %325 = vmatpush1.bf16.msra.mxu0 %v1507_v4  ;;  %v238_v14 = vpack.c.bf16 %v1684_v13, %v1681_v12  ;;  %v239_v17 = vpack.c.bf16 %v234_v16, %v1690_v15  ;;  %v1696_v18 = vld [vmem:[%s1666_s13 + $0x30] sm:$0xff]  ;;  %v1699_v19 = vld [vmem:[%s1666_s13 + $0x38] sm:$0xff]  ;;  %v249_v24 = vld [vmem:[%s1989_s2] sm:$0x3] }
  0x12   : > { %326 = vmatprep.subr.bf16.mxu0 %v1508_v5  ;;  %v240_v20 = vpack.c.bf16 %v1699_v19, %v1696_v18  ;;  %v254_v26 = vrot.slane %v249_v24, %v253_v23  ;;  %v258_v51 = vrot.slane %v249_v24, %v257_v48 }
  0x15   : > { %327 = vmatpush1.bf16.msra.mxu0 %v1510_v6 }
  0x16   : > { %328 = vmatprep.subr.bf16.mxu0 %v1511_v7 }
  0x19   : > { %329 = vmatpush1.bf16.msra.mxu0 %v1513_v8 }
  0x1c   : > { %1287 = vmatmul.mubr.msk.bf16.vlgmr.msra.gmra.mxu0 %vm301_vm0, %v237_v11 }
  0x1d   : > { %356 = vmatprep.mubr.bf16.mxu0 %v1595_v2 }
  0x24   : > { %1288 = vmatmul.mubr.msk.bf16.gmra.mxu0 %vm301_vm0, %v238_v14 }
  0x25   : > { %366 = vmatprep.mubr.bf16.mxu0 %v1595_v2 }
  0x2c   : > { %1289 = vmatmul.mubr.msk.bf16.gmra.mxu0 %vm301_vm0, %v239_v17 }
  0x2d   : > { %376 = vmatprep.mubr.bf16.mxu0 %v1595_v2 }
  0x34   : > { %1290 = vmatmul.mubr.msk.bf16.gmra.mxu0 %vm301_vm0, %v240_v20 }
  0xdc   : > { %v348_v25 = vpop.f32.mrf.mxu0 }
  0xdd   : > { %v349_v29 = vadd.f32 %v348_v25, %v254_v26 }
  0xde   : > { %v350_v27 = vpop.f32.mrf.mxu0 }
  0xdf   : > { %v351_v2 = vadd.f32 %v350_v27, %v258_v51 }
  0xe0   : > { %v352_v28 = vpop.f32.mrf.mxu0 }
  0xe1   : > { %v353_v30 = vadd.f32 %v352_v28, %v254_v26 }
  0xe2   : > { %v354_v31 = vpop.f32.mrf.mxu0 }
  0xe3   : > { %v387_v32 = vpack.c.bf16 %v353_v30, %v349_v29  ;;  %v355_v0 = vadd.f32 %v354_v31, %v258_v51 }
  0xe4   : > { %v358_v33 = vpop.f32.mrf.mxu0 }
  0xe5   : > { %1402 = vmatprep.mubr.msk.bf16.mxu1 %vm407_vm1, %v387_v32  ;;  %v359_v36 = vadd.f32 %v358_v33, %v254_v26  ;;  %v1733_v3 = vpack.c.bf16 %v355_v0, %v351_v2 }
  0xe6   : > { %v360_v34 = vpop.f32.mrf.mxu0 }
  0xe7   : > { %v361_v63 = vadd.f32 %v360_v34, %v258_v51 }
  0xe8   : > { %v362_v35 = vpop.f32.mrf.mxu0 }
  0xe9   : > { %v363_v37 = vadd.f32 %v362_v35, %v254_v26 }
  0xea   : > { %v364_v38 = vpop.f32.mrf.mxu0 }
  0xeb   : > { %v1708_v39 = vpack.c.bf16 %v363_v37, %v359_v36  ;;  %v365_v61 = vadd.f32 %v364_v38, %v258_v51 }
  0xec   : > { %v368_v40 = vpop.f32.mrf.mxu0 }
  0xed   : > { %401 = vrot.lane.b32.xlu1 %v1708_v39, %s1596_s19  ;;  %v369_v43 = vadd.f32 %v368_v40, %v254_v26  ;;  %v1727_v1 = vpack.c.bf16 %v365_v61, %v361_v63 }
  0xee   : > { %v370_v41 = vpop.f32.mrf.mxu0 }
  0xef   : > { %v371_v59 = vadd.f32 %v370_v41, %v258_v51 }
  0xf0   : > { %v372_v42 = vpop.f32.mrf.mxu0 }
  0xf1   : > { %v373_v44 = vadd.f32 %v372_v42, %v254_v26  ;;  %399 = vrot.lane.b32.xlu1 %v387_v32, %s1596_s19 }
  0xf2   : > { %v374_v45 = vpop.f32.mrf.mxu0 }
  0xf3   : > { %v1713_v46 = vpack.c.bf16 %v373_v44, %v369_v43  ;;  %v375_v55 = vadd.f32 %v374_v45, %v258_v51 }
  0xf4   : > { %v378_v47 = vpop.f32.mrf.mxu0 }
  0xf5   : > { %719 = vrot.lane.b32.xlu1 %v1713_v46, %s1597_s20  ;;  %v379_v52 = vadd.f32 %v378_v47, %v254_v26  ;;  %v1721_v62 = vpack.c.bf16 %v375_v55, %v371_v59 }
  0xf6   : > { %v380_v49 = vpop.f32.mrf.mxu0 }
  0xf7   : > { %v381_v56 = vadd.f32 %v380_v49, %v258_v51 }
  0xf8   : > { %v382_v50 = vpop.f32.mrf.mxu0 }
  0xf9   : > { %v383_v53 = vadd.f32 %v382_v50, %v254_v26  ;;  %715 = vrot.lane.b32.xlu1 %v387_v32, %s1597_s20 }
  0xfa   : > { %v384_v54 = vpop.f32.mrf.mxu0 }
  0xfb   : > { %v393_v57 = vpack.c.bf16 %v383_v53, %v379_v52  ;;  %v385_v58 = vadd.f32 %v384_v54, %v258_v51 }
  0xfd   : > { %v394_v60 = vpack.c.bf16 %v385_v58, %v381_v56  ;;  %405 = vrot.lane.b32.xlu0 %v393_v57, %s1596_s19  ;;  %709 = vrot.lane.b32.xlu1 %v1708_v39, %s1598_s21 }
  0xff   : > { %1410 = vmatprep.subr.bf16.mxu0 %v394_v60 }
 0x100   : > { %1411 = vmatpush3.bf16.msra.mxu0 %v394_v60 }
 0x101   : > { %1412 = vmatprep.subr.bf16.mxu0 %v1721_v62  ;;  %403 = vrot.lane.b32.xlu0 %v1713_v46, %s1596_s19 }
 0x102   : > { %713 = vrot.lane.b32.xlu1 %v393_v57, %s1598_s21 }
 0x104   : > { %1413 = vmatpush3.bf16.msra.mxu0 %v1721_v62 }
 0x105   : > { %721 = vrot.lane.b32.xlu0 %v393_v57, %s1597_s20  ;;  %1414 = vmatprep.subr.bf16.mxu0 %v1727_v1 }
 0x106   : > { %898 = vrot.lane.b32.xlu1 %v394_v60, %s1598_s21 }
 0x108   : > { %1415 = vmatpush3.bf16.msra.mxu0 %v1727_v1 }
 0x109   : > { %717 = vrot.lane.b32.xlu0 %v1708_v39, %s1597_s20  ;;  %1416 = vmatprep.subr.bf16.mxu0 %v1733_v3 }
 0x10c   : > { %1417 = vmatpush3.bf16.msra.mxu0 %v1733_v3 }
 0x10d   : > { %707 = vrot.lane.b32.xlu0 %v387_v32, %s1598_s21 }
 0x111   : > { %711 = vrot.lane.b32.xlu0 %v1713_v46, %s1598_s21 }
 0x15f   : > { %v402_v4 = vpop.permute.xlu1 %401 }
 0x160   : > { %v424_v22 = vsel %vm407_vm1, %v402_v4, 0 }
 0x163   : > { %v400_v5 = vpop.permute.xlu1 %399 }
 0x164   : > { %v421_v23 = vsel %vm407_vm1, %v400_v5, 0 }
 0x167   : > { %v720_v6 = vpop.permute.xlu1 %719 }
 0x168   : > { %v742_v27 = vsel %vm407_vm1, %v720_v6, 0 }
 0x16b   : > { %v716_v7 = vpop.permute.xlu1 %715 }
 0x16c   : > { %v736_v30 = vsel %vm407_vm1, %v716_v7, 0 }
 0x16f   : > { %v406_v8 = vpop.permute.xlu0 %405  ;;  %v710_v11 = vpop.permute.xlu1 %709 }
 0x170   : > { %1482 = vmatprep.subr.msk.bf16.mxu1 %vm407_vm1, %v406_v8  ;;  %v430_v14 = vsel %vm407_vm1, %v406_v8, 0 }
 0x171   : > { %1395 = vmatpush3.bf16.xpose.msra.mxu1 %v430_v14 }
 0x173   : > { %v404_v16 = vpop.permute.xlu0 %403 }
 0x174   : > { %v714_v17 = vpop.permute.xlu1 %713  ;;  %1483 = vmatprep.subr.msk.bf16.mxu1 %vm407_vm1, %v404_v16  ;;  %v427_v21 = vsel %vm407_vm1, %v404_v16, 0 }
 0x177   : > { %v722_v24 = vpop.permute.xlu0 %721 }
 0x178   : > { %v1746_v20 = vpop.permute.xlu1 %898  ;;  %v745_v25 = vsel %vm407_vm1, %v722_v24, 0 }
 0x179   : > { %1442 = vmatprep.subr.bf16.mxu0 %v1746_v20  ;;  %1397 = vmatpush3.bf16.xpose.msra.mxu1 %v427_v21 }
 0x17a   : > { %1484 = vmatprep.subr.msk.bf16.mxu1 %vm407_vm1, %v402_v4 }
 0x17b   : > { %v718_v26 = vpop.permute.xlu0 %717 }
 0x17c   : > { %v739_v29 = vsel %vm407_vm1, %v718_v26, 0 }
 0x17f   : > { %v708_v28 = vpop.permute.xlu0 %707 }
 0x181   : > { %1399 = vmatpush3.bf16.xpose.msra.mxu1 %v424_v22 }
 0x182   : > { %1485 = vmatprep.subr.msk.bf16.mxu1 %vm407_vm1, %v400_v5 }
 0x183   : > { %v712_v31 = vpop.permute.xlu0 %711 }
 0x189   : > { %1401 = vmatpush3.bf16.xpose.msra.mxu1 %v421_v23 }
 0x18a   : > { %1486 = vmatprep.subr.msk.bf16.mxu1 %vm407_vm1, %v722_v24 }
 0x190   : > { %1403 = vmatmul.mubr.msk.bf16.vlgmr.msra.gmra.mxu1 %vm407_vm1, %v1708_v39 }
 0x191   : > { %1406 = vmatprep.mubr.msk.bf16.mxu1 %vm407_vm1, %v1713_v46  ;;  %1427 = vmatpush3.bf16.xpose.msra.mxu1 %v745_v25 }
 0x192   : > { %1487 = vmatprep.subr.msk.bf16.mxu1 %vm407_vm1, %v720_v6 }
 0x198   : > { %1407 = vmatmul.mubr.msk.bf16.gmra.mxu1 %vm407_vm1, %v393_v57 }
 0x199   : > { %1429 = vmatpush3.bf16.xpose.msra.mxu1 %v742_v27  ;;  %1434 = vmatprep.mubr.msk.bf16.mxu1 %vm407_vm1, %v708_v28 }
 0x19a   : > { %1488 = vmatprep.subr.msk.bf16.mxu1 %vm407_vm1, %v718_v26 }
 0x1a1   : > { %1431 = vmatpush3.bf16.xpose.msra.mxu1 %v739_v29 }
 0x1a2   : > { %1489 = vmatprep.subr.msk.bf16.mxu1 %vm407_vm1, %v716_v7 }
 0x1a9   : > { %1433 = vmatpush3.bf16.xpose.msra.mxu1 %v736_v30 }
 0x1b0   : > { %1435 = vmatmul.mubr.msk.bf16.vlgmr.msra.gmra.mxu1 %vm407_vm1, %v710_v11 }
 0x1b1   : > { %1438 = vmatprep.mubr.msk.bf16.mxu1 %vm407_vm1, %v712_v31 }
 0x1b8   : > { %1439 = vmatmul.mubr.msk.bf16.gmra.mxu1 %vm407_vm1, %v714_v17 }
 0x250   : > { %v1404_v32 = vpop.f32.mrf.mxu1 }
 0x251   : > { %v503_v33 = vsel %vm301_vm0, %v1404_v32, -inf }
 0x252   : > { %504 = vmax.xlane.f32.xlu0 %v503_v33  ;;  %v466_v34 = vpop.f32.mrf.mxu1 }
 0x253   : > { %v497_v36 = vsel %vm301_vm0, %v466_v34, -inf }
 0x254   : > { %v1405_v35 = vpop.f32.mrf.mxu1 }
 0x255   : > { %v506_v40 = vsel %vm301_vm0, %v1405_v35, -inf }
 0x256   : > { %498 = vmax.xlane.f32.xlu0 %v497_v36  ;;  %v469_v37 = vpop.f32.mrf.mxu1 }
 0x257   : > { %v500_v38 = vsel %vm301_vm0, %v469_v37, -inf }
 0x258   : > { %501 = vmax.xlane.f32.xlu1 %v500_v38  ;;  %v1774_v39 = vpop.f32.mrf.mxu1 }
 0x259   : > { %v515_v42 = vsel %vm301_vm0, %v1774_v39, -inf }
 0x25a   : > { %507 = vmax.xlane.f32.xlu0 %v506_v40  ;;  %v482_v41 = vpop.f32.mrf.mxu1 }
 0x25b   : > { %v509_v46 = vsel %vm301_vm0, %v482_v41, -inf }
 0x25c   : > { %516 = vmax.xlane.f32.xlu1 %v515_v42  ;;  %v1409_v43 = vpop.f32.mrf.mxu1 }
 0x25d   : > { %v518_v44 = vsel %vm301_vm0, %v1409_v43, -inf }
 0x25e   : > { %519 = vmax.xlane.f32.xlu0 %v518_v44  ;;  %v485_v45 = vpop.f32.mrf.mxu1 }
 0x25f   : > { %v512_v47 = vsel %vm301_vm0, %v485_v45, -inf }
 0x260   : > { %510 = vmax.xlane.f32.xlu1 %v509_v46 }
 0x262   : > { %513 = vmax.xlane.f32.xlu0 %v512_v47 }
 0x270   : > { %v1782_v48 = vpop.f32.mrf.mxu1 }
 0x271   : > { %v818_v49 = vsel %vm301_vm0, %v1782_v48, -inf }
 0x272   : > { %819 = vmax.xlane.f32.xlu1 %v818_v49  ;;  %v1786_v50 = vpop.f32.mrf.mxu1 }
 0x273   : > { %v812_v52 = vsel %vm301_vm0, %v1786_v50, -inf }
 0x274   : > { %v1788_v51 = vpop.f32.mrf.mxu1 }
 0x275   : > { %v821_v53 = vsel %vm301_vm0, %v1788_v51, -inf }
 0x276   : > { %813 = vmax.xlane.f32.xlu1 %v812_v52  ;;  %v1794_v54 = vpop.f32.mrf.mxu1  ;;  %822 = vmax.xlane.f32.xlu0 %v821_v53 }
 0x277   : > { %v815_v57 = vsel %vm301_vm0, %v1794_v54, -inf }
 0x278   : > { %v1796_v55 = vpop.f32.mrf.mxu1 }
 0x279   : > { %v830_v56 = vsel %vm301_vm0, %v1796_v55, -inf }
 0x27a   : > { %831 = vmax.xlane.f32.xlu1 %v830_v56  ;;  %v1802_v58 = vpop.f32.mrf.mxu1  ;;  %816 = vmax.xlane.f32.xlu0 %v815_v57 }
 0x27b   : > { %v824_v60 = vsel %vm301_vm0, %v1802_v58, -inf }
 0x27c   : > { %v1804_v59 = vpop.f32.mrf.mxu1 }
 0x27d   : > { %v833_v61 = vsel %vm301_vm0, %v1804_v59, -inf }
 0x27e   : > { %825 = vmax.xlane.f32.xlu1 %v824_v60  ;;  %v1810_v63 = vpop.f32.mrf.mxu1  ;;  %834 = vmax.xlane.f32.xlu0 %v833_v61 }
 0x27f   : > { %v827_v0 = vsel %vm301_vm0, %v1810_v63, -inf }
 0x282   : > { %828 = vmax.xlane.f32.xlu0 %v827_v0 }
 0x28f   : > { %894 = vrot.lane.b32.xlu1 %v1727_v1, %s1598_s21 }
 0x293   : > { %892 = vrot.lane.b32.xlu1 %v1733_v3, %s1598_s21 }
 0x298   : > { %896 = vrot.lane.b32.xlu0 %v1721_v62, %s1598_s21 }
 0x2db   : > { %v505_v2 = vpop.xlane.xlu0 %504 }
 0x2dc   : > { %v523_v4 = vsub.f32 %v1404_v32, %v505_v2 }
 0x2de   : > { %v533_v14 = vmul.f32 1.442695, %v523_v4 }
 0x2df   : > { %v499_v5 = vpop.xlane.xlu0 %498 }
 0x2e0   : > { %v521_v6 = vsub.f32 %v466_v34, %v499_v5 }
 0x2e1   : > { %v502_v7 = vpop.xlane.xlu1 %501 }
 0x2e2   : > { %v529_v8 = vmul.f32 1.442695, %v521_v6  ;;  %v522_v11 = vsub.f32 %v469_v37, %v502_v7 }
 0x2e3   : > { %v508_v16 = vpop.xlane.xlu0 %507 }
 0x2e4   : > { %v531_v17 = vmul.f32 1.442695, %v522_v11  ;;  %v524_v21 = vsub.f32 %v1405_v35, %v508_v16  ;;  %1522 = vpow2.f32 %v529_v8 }
 0x2e5   : > { %v517_v22 = vpop.xlane.xlu1 %516 }
 0x2e6   : > { %1524 = vpow2.f32 %v531_v17  ;;  %v535_v1 = vmul.f32 1.442695, %v524_v21  ;;  %v527_v62 = vsub.f32 %v1774_v39, %v517_v22 }
 0x2e7   : > { %1526 = vpow2.f32 %v533_v14  ;;  %v520_v3 = vpop.xlane.xlu0 %519 }
 0x2e8   : > { %1528 = vpow2.f32 %v535_v1  ;;  %v528_v23 = vsub.f32 %v1409_v43, %v520_v3  ;;  %v541_v30 = vmul.f32 1.442695, %v527_v62 }
 0x2e9   : > { %v511_v24 = vpop.xlane.xlu1 %510 }
 0x2ea   : > { %v543_v25 = vmul.f32 1.442695, %v528_v23  ;;  %v525_v26 = vsub.f32 %v482_v41, %v511_v24 }
 0x2eb   : > { %v514_v27 = vpop.xlane.xlu0 %513 }
 0x2ec   : > { %v537_v28 = vmul.f32 1.442695, %v525_v26  ;;  %v526_v29 = vsub.f32 %v485_v45, %v514_v27  ;;  %1530 = vpow2.f32 %v543_v25 }
 0x2ee   : > { %v539_v31 = vmul.f32 1.442695, %v526_v29  ;;  %1532 = vpow2.f32 %v537_v28 }
 0x2f0   : > { %1534 = vpow2.f32 %v539_v31 }
 0x2f1   : > { %1536 = vpow2.f32 %v541_v30  ;;  %v1821_v32 = vpop.eup %1522 }
 0x2f3   : > { %v1823_v33 = vpop.eup %1524 }
 0x2f4   : > { %v1825_v34 = vpop.eup %1526  ;;  %v569_v35 = vpack.c.bf16 %v1823_v33, %v1821_v32 }
 0x2f5   : > { %v1829_v36 = vpop.eup %1528 }
 0x2f6   : > { %v570_v37 = vpack.c.bf16 %v1829_v36, %v1825_v34  ;;  %1418 = vmatprep.mubr.msk.bf16.mxu0 %vm301_vm0, %v569_v35  ;;  %v545_v35 = vsel %vm301_vm0, %v1821_v32, 0.0  ;;  %v551_v32 = vsel %vm301_vm0, %v1825_v34, 0.0 }
 0x2f8   : > { %1419 = vmatmul.mubr.msk.bf16.vlgmr.msra.gmra.mxu0 %vm301_vm0, %v570_v37 }
 0x2f9   : > { %1443 = vmatpush3.bf16.msra.mxu0 %v1746_v20  ;;  %v1836_v38 = vpop.eup %1530 }
 0x2fb   : > { %v820_v39 = vpop.xlane.xlu1 %819  ;;  %v1838_v40 = vpop.eup %1532 }
 0x2fc   : > { %v838_v41 = vsub.f32 %v1782_v48, %v820_v39 }
 0x2fd   : > { %v1841_v42 = vpop.eup %1534 }
 0x2fe   : > { %v1843_v43 = vpop.eup %1536  ;;  %v848_v44 = vmul.f32 1.442695, %v838_v41  ;;  %v571_v45 = vpack.c.bf16 %v1841_v42, %v1838_v40  ;;  %v557_v41 = vsel %vm301_vm0, %v1838_v40, 0.0  ;;  %v554_v40 = vsel %vm301_vm0, %v1829_v36, 0.0 }
 0x2ff   : > { %v814_v46 = vpop.xlane.xlu1 %813  ;;  %v823_v47 = vpop.xlane.xlu0 %822  ;;  %v572_v20 = vpack.c.bf16 %v1836_v38, %v1843_v43 }
 0x300   : > { %1538 = vpow2.f32 %v848_v44  ;;  %v836_v49 = vsub.f32 %v1786_v50, %v814_v46  ;;  %v839_v52 = vsub.f32 %v1788_v51, %v823_v47  ;;  %1422 = vmatprep.mubr.msk.bf16.mxu0 %vm301_vm0, %v571_v45  ;;  %v548_v44 = vsel %vm301_vm0, %v1823_v33, 0.0 }
 0x301   : > { %1423 = vmatmul.mubr.msk.bf16.gmra.mxu0 %vm301_vm0, %v572_v20  ;;  %v560_v45 = vsel %vm301_vm0, %v1841_v42, 0.0  ;;  %v563_v46 = vsel %vm301_vm0, %v1843_v43, 0.0  ;;  %v566_v33 = vsel %vm301_vm0, %v1836_v38, 0.0 }
 0x302   : > { %v844_v48 = vmul.f32 1.442695, %v836_v49  ;;  %v850_v53 = vmul.f32 1.442695, %v839_v52 }
 0x303   : > { %v832_v56 = vpop.xlane.xlu1 %831  ;;  %v817_v57 = vpop.xlane.xlu0 %816 }
 0x304   : > { %1540 = vpow2.f32 %v844_v48  ;;  %v842_v60 = vsub.f32 %v1796_v55, %v832_v56  ;;  %v837_v61 = vsub.f32 %v1794_v54, %v817_v57 }
 0x305   : > { %1542 = vpow2.f32 %v850_v53 }
 0x306   : > { %v846_v0 = vmul.f32 1.442695, %v837_v61  ;;  %v856_v2 = vmul.f32 1.442695, %v842_v60 }
 0x307   : > { %v826_v4 = vpop.xlane.xlu1 %825  ;;  %v835_v50 = vpop.xlane.xlu0 %834 }
 0x308   : > { %v840_v51 = vsub.f32 %v1802_v58, %v826_v4  ;;  %1544 = vpow2.f32 %v846_v0  ;;  %v843_v6 = vsub.f32 %v1804_v59, %v835_v50 }
 0x309   : > { %1546 = vpow2.f32 %v856_v2 }
 0x30a   : > { %v852_v5 = vmul.f32 1.442695, %v840_v51  ;;  %v858_v55 = vmul.f32 1.442695, %v843_v6 }
 0x30b   : > { %v829_v7 = vpop.xlane.xlu0 %828  ;;  %v895_v16 = vpop.permute.xlu1 %894 }
 0x30c   : > { %1548 = vpow2.f32 %v852_v5  ;;  %v841_v8 = vsub.f32 %v1810_v63, %v829_v7 }
 0x30d   : > { %v1539_v11 = vpop.eup %1538 }
 0x30e   : > { %v854_v14 = vmul.f32 1.442695, %v841_v8  ;;  %v866_v54 = vsel %vm301_vm0, %v1539_v11, 0.0 }
 0x30f   : > { %867 = vadd.xlane.f32.xlu1 %v866_v54  ;;  %v897_v17 = vpop.permute.xlu0 %896  ;;  %v893_v22 = vpop.permute.xlu1 %892 }
 0x310   : > { %1550 = vpow2.f32 %v854_v14  ;;  %1444 = vmatprep.subr.bf16.mxu0 %v897_v17 }
 0x311   : > { %v1541_v58 = vpop.eup %1540  ;;  %1445 = vmatpush3.bf16.msra.mxu0 %v897_v17  ;;  %1552 = vpow2.f32 %v858_v55 }
 0x312   : > { %1446 = vmatprep.subr.bf16.mxu0 %v895_v16  ;;  %v860_v59 = vsel %vm301_vm0, %v1541_v58, 0.0  ;;  %v1543_v21 = vpop.eup %1542 }
 0x313   : > { %861 = vadd.xlane.f32.xlu0 %v860_v59  ;;  %v869_v1 = vsel %vm301_vm0, %v1543_v21, 0.0  ;;  %v885_v25 = vpack.c.bf16 %v1543_v21, %v1539_v11 }
 0x315   : > { %1447 = vmatpush3.bf16.msra.mxu0 %v895_v16  ;;  %v1545_v63 = vpop.eup %1544 }
 0x316   : > { %1448 = vmatprep.subr.bf16.mxu0 %v893_v22  ;;  %v863_v3 = vsel %vm301_vm0, %v1545_v63, 0.0  ;;  %v884_v23 = vpack.c.bf16 %v1545_v63, %v1541_v58  ;;  %v1547_v62 = vpop.eup %1546 }
 0x317   : > { %870 = vadd.xlane.f32.xlu0 %v869_v1  ;;  %864 = vadd.xlane.f32.xlu1 %v863_v3  ;;  %v878_v27 = vsel %vm301_vm0, %v1547_v62, 0.0 }
 0x318   : > { %1450 = vmatprep.mubr.msk.bf16.mxu0 %vm301_vm0, %v884_v23 }
 0x319   : > { %v1549_v24 = vpop.eup %1548  ;;  %1449 = vmatpush3.bf16.msra.mxu0 %v893_v22 }
 0x31a   : > { %v872_v26 = vsel %vm301_vm0, %v1549_v24, 0.0 }
 0x31b   : > { %873 = vadd.xlane.f32.xlu0 %v872_v26  ;;  %879 = vadd.xlane.f32.xlu1 %v878_v27 }
 0x31c   : > { %1451 = vmatmul.mubr.msk.bf16.vlgmr.msra.gmra.mxu0 %vm301_vm0, %v885_v25 }
 0x31d   : > { %v1551_v28 = vpop.eup %1550 }
 0x31e   : > { %v875_v29 = vsel %vm301_vm0, %v1551_v28, 0.0  ;;  %v886_v30 = vpack.c.bf16 %v1551_v28, %v1549_v24  ;;  %v1553_v31 = vpop.eup %1552 }
 0x31f   : > { %876 = vadd.xlane.f32.xlu0 %v875_v29  ;;  %546 = vadd.xlane.f32.xlu1 %v545_v35  ;;  %v881_v37 = vsel %vm301_vm0, %v1553_v31, 0.0  ;;  %v887_v39 = vpack.c.bf16 %v1553_v31, %v1547_v62 }
 0x320   : > { %1454 = vmatprep.mubr.msk.bf16.mxu0 %vm301_vm0, %v886_v30 }
 0x323   : > { %882 = vadd.xlane.f32.xlu0 %v881_v37  ;;  %558 = vadd.xlane.f32.xlu1 %v557_v41  ;;  %v1514_v37 = vld [vmem:[%s1990_s3 + $0x18] sm:$0xff]   ;;  %v1516_v41 = vld [vmem:[%s1990_s3 + $0x8] sm:$0xff]  }
 0x324   : > { %1455 = vmatmul.mubr.msk.bf16.gmra.mxu0 %vm301_vm0, %v887_v39  ;;  %1458 = vmatprep.subr.bf16.mxu0 %v1514_v37  ;;  %v1515_v39 = vld [vmem:[%s1990_s3 + $0x10] sm:$0xff]  }
 0x325   : > { %1474 = vmatprep.subr.bf16.mxu1 %v1514_v37  ;;  %1459 = vmatpush3.bf16.msra.mxu0 %v1514_v37 }
 0x326   : > { %1478 = vmatpush3.bf16.msra.mxu1 %v1514_v37  ;;  %1460 = vmatprep.subr.bf16.mxu0 %v1515_v39 }
 0x327   : > { %549 = vadd.xlane.f32.xlu0 %v548_v44  ;;  %552 = vadd.xlane.f32.xlu1 %v551_v32 }
 0x328   : > { %1475 = vmatprep.subr.bf16.mxu1 %v1515_v39 }
 0x329   : > { %1461 = vmatpush3.bf16.msra.mxu0 %v1515_v39 }
 0x32a   : > { %1479 = vmatpush3.bf16.msra.mxu1 %v1515_v39  ;;  %1462 = vmatprep.subr.bf16.mxu0 %v1516_v41 }
 0x32b   : > { %561 = vadd.xlane.f32.xlu0 %v560_v45  ;;  %564 = vadd.xlane.f32.xlu1 %v563_v46 }
 0x32c   : > { %1476 = vmatprep.subr.bf16.mxu1 %v1516_v41 }
 0x32d   : > { %1463 = vmatpush3.bf16.msra.mxu0 %v1516_v41 }
 0x32e   : > { %1480 = vmatpush3.bf16.msra.mxu1 %v1516_v41 }
 0x32f   : > { %555 = vadd.xlane.f32.xlu0 %v554_v40 }
 0x333   : > { %567 = vadd.xlane.f32.xlu0 %v566_v33  ;;  %v1517_v33 = vld [vmem:[%s1990_s3] sm:$0xff]  }
 0x334   : > { %1464 = vmatprep.subr.bf16.mxu0 %v1517_v33  ;;  %1477 = vmatprep.subr.bf16.mxu1 %v1517_v33 }
 0x335   : > { %1465 = vmatpush3.bf16.msra.mxu0 %v1517_v33  ;;  %1481 = vmatpush3.bf16.msra.mxu1 %v1517_v33 }
 0x398   : > { %v1888_v34 = vpop.xlane.xlu1 %867 }
 0x39c   : > { %v1886_v47 = vpop.xlane.xlu0 %861 }
 0x3a0   : > { %v1890_v20 = vpop.xlane.xlu0 %870  ;;  %v1892_v42 = vpop.xlane.xlu1 %864 }
 0x3a4   : > { %v1894_v49 = vpop.xlane.xlu0 %873  ;;  %v1896_v43 = vpop.xlane.xlu1 %879 }
 0x3a8   : > { %v1898_v52 = vpop.xlane.xlu0 %876  ;;  %v547_v36 = vpop.xlane.xlu1 %546 }
 0x3a9   : > { %1554 = vrcp.f32 %v547_v36 }
 0x3ac   : > { %v1900_v48 = vpop.xlane.xlu0 %882  ;;  %v559_v38 = vpop.xlane.xlu1 %558 }
 0x3b0   : > { %v550_v53 = vpop.xlane.xlu0 %549  ;;  %v553_v56 = vpop.xlane.xlu1 %552 }
 0x3b1   : > { %1556 = vrcp.f32 %v550_v53 }
 0x3b2   : > { %1558 = vrcp.f32 %v553_v56 }
 0x3b3   : > { %1560 = vrcp.f32 %v559_v38 }
 0x3b4   : > { %v562_v57 = vpop.xlane.xlu0 %561  ;;  %v565_v60 = vpop.xlane.xlu1 %564 }
 0x3b5   : > { %1562 = vrcp.f32 %v565_v60 }
 0x3b6   : > { %v1555_v2 = vpop.eup %1554 }
 0x3b8   : > { %v1420_v61 = vpop.f32.mrf.mxu0  ;;  %v556_v0 = vpop.xlane.xlu0 %555 }
 0x3b9   : > { %1564 = vrcp.f32 %v556_v0 }
 0x3ba   : > { %1566 = vrcp.f32 %v562_v57  ;;  %v619_v4 = vpop.f32.mrf.mxu0 }
 0x3bb   : > { %v658_v50 = vmul.f32 %v1555_v2, %v619_v4 }
 0x3bc   : > { %v1421_v51 = vpop.f32.mrf.mxu0  ;;  %v568_v5 = vpop.xlane.xlu0 %567 }
 0x3bd   : > { %v1338_v6 = vpack.c.bf16 %v658_v50, %v658_v50  ;;  %1568 = vrcp.f32 %v568_v5 }
 0x3be   : > { %v1557_v7 = vpop.eup %1556  ;;  %v622_v8 = vpop.f32.mrf.mxu0  ;;  %1570 = vrcp.f32 %v1888_v34 }
 0x3bf   : > { %v1559_v11 = vpop.eup %1558  ;;  %699 = vst.msk [vmem:[#allocation2] sm:$0xf] %vm698_vm2, %v1338_v6  ;;  %v659_v55 = vmul.f32 %v1557_v7, %v622_v8  ;;  %1572 = vrcp.f32 %v1886_v47 }
 0x3c0   : > { %v660_v14 = vmul.f32 %v1559_v11, %v1420_v61  ;;  %v1561_v17 = vpop.eup %1560  ;;  %1574 = vrcp.f32 %v1890_v20 }
 0x3c1   : > { %v1339_v54 = vpack.c.bf16 %v659_v55, %v659_v55  ;;  %v1424_v16 = vpop.f32.mrf.mxu0  ;;  %1576 = vrcp.f32 %v1892_v42 }
 0x3c2   : > { %v1340_v58 = vpack.c.bf16 %v660_v14, %v660_v14  ;;  %v1563_v59 = vpop.eup %1562  ;;  %1578 = vrcp.f32 %v1896_v43 }
 0x3c3   : > { %700 = vst.msk [vmem:[#allocation2 + $0x4] sm:$0xf] %vm698_vm2, %v1339_v54  ;;  %v635_v21 = vpop.f32.mrf.mxu0  ;;  %v664_v22 = vmul.f32 %v1563_v59, %v1424_v16  ;;  %1580 = vrcp.f32 %v1894_v49 }
 0x3c4   : > { %701 = vst.msk [vmem:[#allocation2 + $0x8] sm:$0xf] %vm698_vm2, %v1340_v58  ;;  %v662_v63 = vmul.f32 %v1561_v17, %v635_v21  ;;  %1582 = vrcp.f32 %v1898_v52 }
 0x3c5   : > { %v1425_v1 = vpop.f32.mrf.mxu0  ;;  %v1344_v23 = vpack.c.bf16 %v664_v22, %v664_v22  ;;  %1584 = vrcp.f32 %v1900_v48 }
 0x3c6   : > { %v1565_v3 = vpop.eup %1564  ;;  %v1342_v62 = vpack.c.bf16 %v662_v63, %v662_v63 }
 0x3c7   : > { %v1567_v24 = vpop.eup %1566  ;;  %v661_v25 = vmul.f32 %v1565_v3, %v1421_v51  ;;  %v638_v26 = vpop.f32.mrf.mxu0  ;;  %705 = vst.msk [vmem:[#allocation2 + $0x18] sm:$0xf] %vm698_vm2, %v1344_v23 }
 0x3c8   : > { %703 = vst.msk [vmem:[#allocation2 + $0x10] sm:$0xf] %vm698_vm2, %v1342_v62  ;;  %v663_v27 = vmul.f32 %v1567_v24, %v638_v26  ;;  %v1323_v24 = vld [vmem:[%s1991_s4] ss:$0 sm:$0xff] }
 0x3c9   : > { %v1341_v28 = vpack.c.bf16 %v661_v25, %v661_v25 }
 0x3ca   : > { %v1569_v29 = vpop.eup %1568  ;;  %v1343_v30 = vpack.c.bf16 %v663_v27, %v663_v27 }
 0x3cb   : > { %702 = vst.msk [vmem:[#allocation2 + $0xc] sm:$0xf] %vm698_vm2, %v1341_v28  ;;  %v665_v31 = vmul.f32 %v1569_v29, %v1425_v1  ;;  %v1571_v44 = vpop.eup %1570 }
 0x3cc   : > { %704 = vst.msk [vmem:[#allocation2 + $0x14] sm:$0xf] %vm698_vm2, %v1343_v30  ;;  %v1573_v46 = vpop.eup %1572 }
 0x3cd   : > { %v1345_v35 = vpack.c.bf16 %v665_v31, %v665_v31  ;;  %v1575_v20 = vpop.eup %1574 }
 0x3ce   : > { %v1577_v52 = vpop.eup %1576 }
 0x3cf   : > { %706 = vst.msk [vmem:[#allocation2 + $0x1c] sm:$0xf] %vm698_vm2, %v1345_v35  ;;  %v1579_v53 = vpop.eup %1578 }
 0x3d0   : > { %v1581_v61 = vpop.eup %1580 }
 0x3d1   : > { %v1583_v5 = vpop.eup %1582 }
 0x3d2   : > { %v1585_v8 = vpop.eup %1584 }
 0x3dc   : > { %v1452_v32 = vpop.f32.mrf.mxu0 }
 0x3dd   : > { %v991_v45 = vmul.f32 %v1571_v44, %v1452_v32 }
 0x3de   : > { %v950_v40 = vpop.f32.mrf.mxu0 }
 0x3df   : > { %v1348_v47 = vpack.c.bf16 %v991_v45, %v991_v45  ;;  %v989_v34 = vmul.f32 %v1573_v46, %v950_v40 }
 0x3e0   : > { %v1453_v42 = vpop.f32.mrf.mxu0 }
 0x3e1   : > { %v1346_v49 = vpack.c.bf16 %v989_v34, %v989_v34  ;;  %v992_v43 = vmul.f32 %v1575_v20, %v1453_v42  ;;  %1025 = vrot.lane.b32.xlu0 %v1348_v47, %s1597_s20  ;;  %v1586_v20 = vld [vmem:[%s1666_s13 + $0x28] sm:$0xff] }
 0x3e2   : > { %v953_v36 = vpop.f32.mrf.mxu0 }
 0x3e3   : > { %v990_v38 = vmul.f32 %v1577_v52, %v953_v36  ;;  %1021 = vrot.lane.b32.xlu1 %v1346_v49, %s1597_s20  ;;  %v1349_v48 = vpack.c.bf16 %v992_v43, %v992_v43 }
 0x3e4   : > { %v1456_v56 = vpop.f32.mrf.mxu0 }
 0x3e5   : > { %v1347_v57 = vpack.c.bf16 %v990_v38, %v990_v38  ;;  %v995_v60 = vmul.f32 %v1579_v53, %v1456_v56 }
 0x3e6   : > { %v966_v0 = vpop.f32.mrf.mxu0 }
 0x3e7   : > { %v993_v2 = vmul.f32 %v1581_v61, %v966_v0  ;;  %1023 = vrot.lane.b32.xlu0 %v1347_v57, %s1597_s20  ;;  %1027 = vrot.lane.b32.xlu1 %v1349_v48, %s1597_s20  ;;  %v1352_v50 = vpack.c.bf16 %v995_v60, %v995_v60 }
 0x3e8   : > { %v1457_v4 = vpop.f32.mrf.mxu0 }
 0x3e9   : > { %v1350_v51 = vpack.c.bf16 %v993_v2, %v993_v2  ;;  %v996_v11 = vmul.f32 %v1585_v8, %v1457_v4 }
 0x3ea   : > { %v969_v6 = vpop.f32.mrf.mxu0 }
 0x3eb   : > { %v994_v7 = vmul.f32 %v1583_v5, %v969_v6  ;;  %1033 = vrot.lane.b32.xlu0 %v1352_v50, %s1597_s20  ;;  %1029 = vrot.lane.b32.xlu1 %v1350_v51, %s1597_s20  ;;  %v1353_v14 = vpack.c.bf16 %v996_v11, %v996_v11 }
 0x3ed   : > { %v1351_v55 = vpack.c.bf16 %v994_v7, %v994_v7 }
 0x3ef   : > { %1031 = vrot.lane.b32.xlu1 %v1351_v55, %s1597_s20 }
 0x3f3   : > { %1035 = vrot.lane.b32.xlu1 %v1353_v14, %s1597_s20 }
 0x453   : > { %v1026_v54 = vpop.permute.xlu0 %1025 }
 0x454   : > { %1048 = vst.msk [vmem:[#allocation2 + $0x8] sm:$0xf] %vm1045_vm3, %v1026_v54 }
 0x455   : > { %v1022_v16 = vpop.permute.xlu1 %1021 }
 0x456   : > { %1046 = vst.msk [vmem:[#allocation2] sm:$0xf] %vm1045_vm3, %v1022_v16 }
 0x459   : > { %v1028_v17 = vpop.permute.xlu1 %1027  ;;  %v1024_v58 = vpop.permute.xlu0 %1023 }
 0x45a   : > { %1049 = vst.msk [vmem:[#allocation2 + $0xc] sm:$0xf] %vm1045_vm3, %v1028_v17  ;;  %1047 = vst.msk [vmem:[#allocation2 + $0x4] sm:$0xf] %vm1045_vm3, %v1024_v58 }
 0x45d   : > { %v1030_v59 = vpop.permute.xlu1 %1029  ;;  %v1034_v21 = vpop.permute.xlu0 %1033 }
 0x45e   : > { %1050 = vst.msk [vmem:[#allocation2 + $0x10] sm:$0xf] %vm1045_vm3, %v1030_v59  ;;  %1052 = vst.msk [vmem:[#allocation2 + $0x18] sm:$0xf] %vm1045_vm3, %v1034_v21 }
 0x461   : > { %v1032_v22 = vpop.permute.xlu1 %1031  ;;  %v1518_v63 = vld [vmem:[#allocation2] sm:$0xff]   ;;  %v1519_v1 = vld [vmem:[#allocation2 + $0x8] sm:$0xff]  }
 0x462   : > { %1051 = vst.msk [vmem:[#allocation2 + $0x14] sm:$0xf] %vm1045_vm3, %v1032_v22  ;;  %1466 = vmatprep.mubr.msk.bf16.mxu0 %vm301_vm0, %v1518_v63 }
 0x463   : > { %1467 = vmatmul.mubr.msk.bf16.vlgmr.msra.gmra.mxu0 %vm301_vm0, %v1519_v1 }
 0x465   : > { %v1036_v3 = vpop.permute.xlu1 %1035 }
 0x466   : > { %1053 = vst.msk [vmem:[#allocation2 + $0x1c] sm:$0xf] %vm1045_vm3, %v1036_v3 }
 0x469   : > { %v1520_v23 = vld [vmem:[#allocation2 + $0x10] sm:$0xff]  }
 0x46a   : > { %1470 = vmatprep.mubr.msk.bf16.mxu1 %vm301_vm0, %v1520_v23 }
 0x46d   : > { %v1521_v62 = vld [vmem:[#allocation2 + $0x18] sm:$0xff]  }
 0x46e   : > { %1471 = vmatmul.mubr.msk.bf16.vlgmr.msra.gmra.mxu1 %vm301_vm0, %v1521_v62 }
 0x523   : > { %v1468_v25 = vpop.f32.mrf.mxu0 }
 0x524   : > { %v1176_v26 = vadd.f32 %v1468_v25, %v1323_v24 }
 0x525   : > { %v1167_v27 = vpop.f32.mrf.mxu0 }
 0x526   : > { %v1200_v28 = vadd.f32 %v1176_v26, %v1681_v12  ;;  %v1168_v29 = vadd.f32 %v1323_v24, %v1167_v27 }
 0x527   : > { %v1469_v30 = vpop.f32.mrf.mxu0 }
 0x528   : > { %1208 = vst.msk [vmem:[%s1958_s11 + $0x10] sm:$0xff] %vm301_vm0, %v1200_v28  ;;  %v1198_v31 = vadd.f32 %v1168_v29, %v1672_v9  ;;  %v1179_v35 = vadd.f32 %v1469_v30, %v1323_v24 }
 0x529   : > { %v1170_v37 = vpop.f32.mrf.mxu0 }
 0x52a   : > { %1206 = vst.msk [vmem:[%s1958_s11] sm:$0xff] %vm301_vm0, %v1198_v31  ;;  %v1201_v39 = vadd.f32 %v1179_v35, %v1684_v13  ;;  %v1171_v41 = vadd.f32 %v1323_v24, %v1170_v37 }
 0x52c   : > { %1209 = vst.msk [vmem:[%s1958_s11 + $0x18] sm:$0xff] %vm301_vm0, %v1201_v39  ;;  %v1199_v12 = vadd.f32 %v1171_v41, %v1675_v10 }
 0x52e   : > { %1207 = vst.msk [vmem:[%s1958_s11 + $0x8] sm:$0xff] %vm301_vm0, %v1199_v12  ;;  %v1472_v44 = vpop.f32.mrf.mxu1 }
 0x52f   : > { %v1192_v32 = vadd.f32 %v1472_v44, %v1323_v24 }
 0x530   : > { %v1183_v9 = vpop.f32.mrf.mxu1 }
 0x531   : > { %v1204_v45 = vadd.f32 %v1192_v32, %v1696_v18  ;;  %v1184_v46 = vadd.f32 %v1323_v24, %v1183_v9 }
 0x532   : > { %v1473_v40 = vpop.f32.mrf.mxu1 }
 0x533   : > { %1212 = vst.msk [vmem:[%s1958_s11 + $0x30] sm:$0xff] %vm301_vm0, %v1204_v45  ;;  %v1202_v13 = vadd.f32 %v1184_v46, %v1690_v15  ;;  %v1195_v33 = vadd.f32 %v1473_v40, %v1323_v24 }
 0x534   : > { %v1186_v47 = vpop.f32.mrf.mxu1 }
 0x535   : > { %1210 = vst.msk [vmem:[%s1958_s11 + $0x20] sm:$0xff] %vm301_vm0, %v1202_v13  ;;  %v1205_v10 = vadd.f32 %v1195_v33, %v1699_v19  ;;  %v1187_v34 = vadd.f32 %v1323_v24, %v1186_v47 }
 0x537   : > { %1213 = vst.msk [vmem:[%s1958_s11 + $0x38] sm:$0xff] %vm301_vm0, %v1205_v10  ;;  %v1203_v42 = vadd.f32 %v1586_v20, %v1187_v34 }
 0x539   : > { %1211 = vst.msk [vmem:[%s1958_s11 + $0x28] sm:$0xff] %vm301_vm0, %v1203_v42 }
 0x53a PF: > { %s15_s18 = sadd.s32 1, %s1593_s18  }
 0x53b   : > { %p12_p4 = scmp.ge.s32.totalorder %s15_s18, 4  }
 0x53d   :  { %14 = sbr.rel (!%p12_p4) target bundleno = 1 (0x1), region = 70 }

</bundles_post_ra>
